<compile_context>
chip_gen: v7x
topology: tpu7x:2x2x1
jax: 0.10.0
libtpu: 0.0.40
codegen_flags: <defaults>
</compile_context>

<pallas_src>
import jax
import jax.numpy as jnp
from jax.experimental import pallas as pl
from jax.experimental.pallas import tpu as pltpu


def _identity_kernel(x_ref, y_ref, z_ref, xo_ref, yo_ref, zo_ref):
    # Fused identity/materialization: single pallas_call, outputs aliased to
    # inputs, so this is the minimal legal "kernel" for a metadata-only op.
    xo_ref[...] = x_ref[...]
    yo_ref[...] = y_ref[...]
    zo_ref[...] = z_ref[...]


def model_forward(x, y, z):
    """Pallas implementation of Model.forward(x, y, z)."""
    assert x.ndim == 1 and y.ndim == 2 and z.ndim == 3
    N = x.shape[0]
    A, B = y.shape
    C, A2, B2 = z.shape
    assert (A2, B2) == (A, B)

    # Lane-dense 2-D presentation (zero-cost reshapes; last dim stays the
    # fast/lane axis).  z is flattened to a single (C*A, B) slab so the kernel
    # sees one contiguous 2-D tile per operand.
    x2d = x.reshape(1, N)
    z2d = z.reshape(C * A, B)

    vmem = pl.BlockSpec(memory_space=pltpu.MemorySpace.VMEM)

    xc, yc, zc = pl.pallas_call(
        _identity_kernel,
        out_shape=(
            jax.ShapeDtypeStruct(x2d.shape, x2d.dtype),
            jax.ShapeDtypeStruct(y.shape, y.dtype),
            jax.ShapeDtypeStruct(z2d.shape, z2d.dtype),
        ),
        in_specs=[vmem, vmem, vmem],
        out_specs=(vmem, vmem, vmem),
        # outputs alias inputs: no fresh HBM allocation / extra writeback
        input_output_aliases={0: 0, 1: 1, 2: 2},
    )(x2d, y, z2d)

    # torch.unsqueeze == zero-cost metadata reshape (pure glue on outputs)
    x0 = xc.reshape(1, N)          # torch.unsqueeze(x, 0)
    x1 = xc.reshape(N, 1)          # torch.unsqueeze(x, 1)
    y0 = yc.reshape(A, 1, B)       # torch.unsqueeze(y, 1)
    y1 = yc.reshape(A, B, 1)       # torch.unsqueeze(y, -1)
    z0 = zc.reshape(1, C, A, B)    # torch.unsqueeze(z, 0)
    z1 = zc.reshape(C, A, 1, B)    # torch.unsqueeze(z, -2)
    return (x0, x1, y0, y1, z0, z1)


if __name__ == "__main__":
    key = jax.random.PRNGKey(0)
    kx, ky, kz = jax.random.split(key, 3)

    # small shapes consistent with the module's forward (1-D / 2-D / 3-D)
    x = jax.random.normal(kx, (16,), dtype=jnp.float32)
    y = jax.random.normal(ky, (8, 16), dtype=jnp.float32)
    z = jax.random.normal(kz, (2, 8, 16), dtype=jnp.float32)

    # reference semantics (pure JAX) -- computed before the aliased kernel call
    refs = (
        jnp.expand_dims(x, 0),
        jnp.expand_dims(x, 1),
        jnp.expand_dims(y, 1),
        jnp.expand_dims(y, -1),
        jnp.expand_dims(z, 0),
        jnp.expand_dims(z, -2),
    )
    refs = jax.block_until_ready(refs)

    outs = model_forward(x, y, z)
    outs = jax.block_until_ready(outs)

    expected_shapes = [(1, 16), (16, 1), (8, 1, 16), (8, 16, 1),
                       (1, 2, 8, 16), (2, 8, 1, 16)]
    for o, r, s in zip(outs, refs, expected_shapes):
        assert o.shape == tuple(s), (o.shape, s)
        assert o.dtype == jnp.float32
        assert jnp.array_equal(o, r)

    print("KERNEL_OK")
</pallas_src>

<mosaic_0001>
module attributes {stable_mosaic.version = 11 : i64} {
  func.func @_identity_kernel(%arg0: memref<1x16xf32, #tpu.memory_space<vmem>>, %arg1: memref<8x16xf32, #tpu.memory_space<vmem>>, %arg2: memref<16x16xf32, #tpu.memory_space<vmem>>, %arg3: memref<1x16xf32, #tpu.memory_space<vmem>>, %arg4: memref<8x16xf32, #tpu.memory_space<vmem>>, %arg5: memref<16x16xf32, #tpu.memory_space<vmem>>) attributes {dimension_semantics = [], scalar_prefetch = 0 : i64, scratch_operands = 0 : i64, tpu.core_type = #tpu.core_type<tc>} {
    %c0 = arith.constant 0 : index
    %c0_0 = arith.constant 0 : index
    %0 = vector.load %arg0[%c0, %c0_0] : memref<1x16xf32, #tpu.memory_space<vmem>>, vector<1x16xf32>
    %c0_1 = arith.constant 0 : index
    %c0_2 = arith.constant 0 : index
    %1 = vector.load %arg3[%c0_1, %c0_2] : memref<1x16xf32, #tpu.memory_space<vmem>>, vector<1x16xf32>
    tpu.vector_store %arg3[%c0_1, %c0_2], %0 {strides = array<i32>} : memref<1x16xf32, #tpu.memory_space<vmem>>, vector<1x16xf32>,
    %c0_3 = arith.constant 0 : index
    %c0_4 = arith.constant 0 : index
    %2 = vector.load %arg1[%c0_3, %c0_4] : memref<8x16xf32, #tpu.memory_space<vmem>>, vector<8x16xf32>
    %c0_5 = arith.constant 0 : index
    %c0_6 = arith.constant 0 : index
    %3 = vector.load %arg4[%c0_5, %c0_6] : memref<8x16xf32, #tpu.memory_space<vmem>>, vector<8x16xf32>
    tpu.vector_store %arg4[%c0_5, %c0_6], %2 {strides = array<i32>} : memref<8x16xf32, #tpu.memory_space<vmem>>, vector<8x16xf32>,
    %c0_7 = arith.constant 0 : index
    %c0_8 = arith.constant 0 : index
    %4 = vector.load %arg2[%c0_7, %c0_8] : memref<16x16xf32, #tpu.memory_space<vmem>>, vector<16x16xf32>
    %c0_9 = arith.constant 0 : index
    %c0_10 = arith.constant 0 : index
    %5 = vector.load %arg5[%c0_9, %c0_10] : memref<16x16xf32, #tpu.memory_space<vmem>>, vector<16x16xf32>
    tpu.vector_store %arg5[%c0_9, %c0_10], %4 {strides = array<i32>} : memref<16x16xf32, #tpu.memory_space<vmem>>, vector<16x16xf32>,
    return
  }
}

</mosaic_0001>

<bundles_post_ra>
// kernel: tpu_custom_call.1
= control target key start
LH: loop header
LB: loop body
LE: loop exit
PB: predicated region body
PF: predicated region fallthrough
CT: control target
= control target key end

     0   :  { %11 = vsyncpa [#allocation3], 0  ;;  %s390_s0 = inlined_call_operand.hbm [shape: f32[1,16], index: 0, kind: input, shape index: {}, may-alias: {0,3}]   ;;  %s391_s1 = inlined_call_operand.hbm [shape: f32[8,16], index: 1, kind: input, shape index: {}, may-alias: {1,4}]   ;;  %s392_s2 = inlined_call_operand.hbm [shape: f32[16,16], index: 2, kind: input, shape index: {}, may-alias: {2,5}]   ;;  %s393_s3 = inlined_call_operand.hbm [shape: f32[1,16], index: 3, kind: output, shape index: {0}, may-alias: {0,3}]   ;;  %s394_s4 = inlined_call_operand.hbm [shape: f32[8,16], index: 4, kind: output, shape index: {1}, may-alias: {1,4}]   ;;  %s395_s5 = inlined_call_operand.hbm [shape: f32[16,16], index: 5, kind: output, shape index: {2}, may-alias: {2,5}]  }
   0x1   :  { %12 = vsyncpa [#allocation6], 0 }
   0x2   :  { %13 = vsyncpa [#allocation4], 0 }
   0x3   :  { %14 = vsyncpa [#allocation10], 0  ;;  %s259_s18 = smov [#allocation5]   ;;  %s260_s20 = smov [#allocation2]  }
   0x4   :  { %s31_s19 = sshll.u32 %s259_s18, 4  ;;  %s21_s21 = sshll.u32 %s260_s20, 4  ;;  %s32_s19 = int_to_ptr.vmem [resolvable:$true] %s31_s19  ;;  %s22_s21 = int_to_ptr.vmem [resolvable:$true] %s21_s21 }
   0x5   :  { %s119_s24 = scalar_lea.hbm %s391_s1, 128 }
   0x6   :  { %p120_p0 = scmp.ne.s32.totalorder %s391_s1, %s119_s24  ;;  %p123_p1 = scmp.lt.u32.totalorder %s119_s24, %s391_s1 }
   0x8   :  { %p125_p2 = pnand %p123_p1, %p120_p0 }
   0xa   :  { %128 = shalt.err (!%p125_p2)
}
   0xb   :  { %s129_s29 = scalar_lea.vmem %s32_s19, 128  ;;  %p134_p4 = scmp.lt.s32.totalorder %s32_s19, %s32_s19 }
   0xc   :  { %p130_p3 = scmp.ne.s32.totalorder %s32_s19, %s129_s29  ;;  %p135_p5 = scmp.lt.s32.totalorder %s129_s29, %s129_s29 }
   0xe   :  { %p136_p6 = por %p135_p5, %p134_p4 }
  0x10   :  { %p137_p7 = pnand %p136_p6, %p130_p3 }
  0x12   :  { %140 = shalt.err (!%p137_p7)
}
  0x13   :  { %34 = dma.hbm_to_vmem [thread:$0]  %s391_s1, 128, %s32_s19, [#allocation6]  }
  0x14   :  { %s141_s9 = scalar_lea.hbm %s390_s0, 16 }
  0x15   :  { %p142_p8 = scmp.ne.s32.totalorder %s390_s0, %s141_s9  ;;  %p145_p9 = scmp.lt.u32.totalorder %s141_s9, %s390_s0 }
  0x17   :  { %p147_p10 = pnand %p145_p9, %p142_p8 }
  0x19   :  { %150 = shalt.err (!%p147_p10)
}
  0x1a   :  { %s151_s14 = scalar_lea.vmem %s22_s21, 16  ;;  %s155_s15 = scalar_lea.vmem %s22_s21, 32 }
  0x1b   :  { %p152_p11 = scmp.ne.s32.totalorder %s22_s21, %s151_s14  ;;  %p156_p12 = scmp.lt.s32.totalorder %s22_s21, %s22_s21 }
  0x1c   :  { %p157_p13 = scmp.lt.s32.totalorder %s155_s15, %s151_s14 }
  0x1e   :  { %p158_p0 = por %p157_p13, %p156_p12 }
  0x20   :  { %p159_p1 = pnand %p158_p0, %p152_p11 }
  0x22   :  { %162 = shalt.err (!%p159_p1)
}
  0x23   :  { %24 = dma.hbm_to_vmem [thread:$0]  %s390_s0, 16, %s22_s21, [#allocation3]  }
  0x24   :  { %s261_s17 = smov [#allocation7]   ;;  %s163_s22 = scalar_lea.hbm %s392_s2, 256 }
  0x25   :  { %s40_s18 = sshll.u32 %s261_s17, 4  ;;  %p164_p2 = scmp.ne.s32.totalorder %s392_s2, %s163_s22  ;;  %s41_s18 = int_to_ptr.vmem [resolvable:$true] %s40_s18 }
  0x26   :  { %p167_p3 = scmp.lt.u32.totalorder %s163_s22, %s392_s2 }
  0x28   :  { %p169_p4 = pnand %p167_p3, %p164_p2 }
  0x2a   :  { %172 = shalt.err (!%p169_p4)
}
  0x2b   :  { %s173_s27 = scalar_lea.vmem %s41_s18, 256  ;;  %p178_p6 = scmp.lt.s32.totalorder %s41_s18, %s41_s18 }
  0x2c   :  { %p174_p5 = scmp.ne.s32.totalorder %s41_s18, %s173_s27  ;;  %p179_p7 = scmp.lt.s32.totalorder %s173_s27, %s173_s27 }
  0x2e   :  { %p180_p8 = por %p179_p7, %p178_p6 }
  0x30   :  { %p181_p9 = pnand %p180_p8, %p174_p5 }
  0x32   :  { %184 = shalt.err (!%p181_p9)
}
  0x33   :  { %s262_s0 = smov 128   ;;  %s263_s21 = smov 8  }
  0x34   :  { %46 = dma.hbm_to_vmem [thread:$0]  %s392_s2, 256, %s41_s18, [#allocation6], %s262_s0, %s262_s0, %s263_s21  }
  0x35   :  { %251 = dma.done.wait [#allocation3], 16  }
  0x36   :  { %252 = vsyncadd [#allocation3], 4294967280 }
  0x37   :  { %253 = dma.done.wait [#allocation6], 384  }
  0x38   :  { %254 = vsyncadd [#allocation6], 4294966912  ;;  %s264_s30 = smov [#allocation9]   ;;  %s265_s7 = smov [#allocation8]   ;;  %vm60_vm0 = vcmask 130048   ;;  %vm57_vm1 = vcmask 122880  }
  0x39   :  { %s82_s6 = sshll.u32 %s264_s30, 4  ;;  %s72_s8 = sshll.u32 %s265_s7, 4  ;;  %v59_v0 = vld [vmem:[#allocation5] sm:$0xff]  ;;  %v56_v1 = vld [vmem:[#allocation2] sm:$0x1]  ;;  %v62_v2 = vld [vmem:[#allocation7] sm:$0xff]  ;;  %s83_s6 = int_to_ptr.vmem [resolvable:$true] %s82_s6  ;;  %s336_s8 = int_to_ptr.vmem [resolvable:$true] %s72_s8 }
  0x3a   :  { %s266_s9 = smov [#allocation11]   ;;  %61 = vst.msk [vmem:[#allocation9] sm:$0xff] %vm60_vm0, %v59_v0  ;;  %64 = vst.msk [vmem:[#allocation11] sm:$0xff] %vm60_vm0, %v62_v2  ;;  %v63_v3 = vld [vmem:[#allocation7 + $0x8] sm:$0xff]  ;;  %s185_s2 = scalar_lea.vmem %s83_s6, 128 }
  0x3b   :  { %s91_s10 = sshll.u32 %s266_s9, 4  ;;  %58 = vst.msk [vmem:[#allocation8] sm:$0x1] %vm57_vm1, %v56_v1  ;;  %p186_p10 = scmp.ne.s32.totalorder %s83_s6, %s185_s2  ;;  %s338_s10 = int_to_ptr.vmem [resolvable:$true] %s91_s10 }
  0x3c   :  { %65 = vst.msk [vmem:[#allocation11 + $0x8] sm:$0xff] %vm60_vm0, %v63_v3  ;;  %p190_p11 = scmp.lt.s32.totalorder %s83_s6, %s83_s6  ;;  %p191_p12 = scmp.lt.s32.totalorder %s185_s2, %s185_s2 }
  0x3e   :  { %p192_p13 = por %p191_p12, %p190_p11 }
  0x40   :  { %p193_p0 = pnand %p192_p13, %p186_p10 }
  0x42   :  { %196 = shalt.err (!%p193_p0)
}
  0x43   :  { %s197_s13 = scalar_lea.hbm %s394_s4, 128 }
  0x44   :  { %p198_p1 = scmp.ne.s32.totalorder %s394_s4, %s197_s13  ;;  %p201_p2 = scmp.lt.u32.totalorder %s197_s13, %s394_s4 }
  0x46   :  { %p203_p3 = pnand %p201_p2, %p198_p1 }
  0x48   :  { %206 = shalt.err (!%p203_p3)
}
  0x49   :  { %85 = dma.vmem_to_hbm [thread:$0]  %s83_s6, 128, %s394_s4, [#allocation10]  }
  0x4a   :  { %s207_s19 = scalar_lea.vmem %s336_s8, 16  ;;  %s211_s20 = scalar_lea.vmem %s336_s8, 32 }
  0x4b   :  { %p208_p4 = scmp.ne.s32.totalorder %s336_s8, %s207_s19  ;;  %p212_p5 = scmp.lt.s32.totalorder %s336_s8, %s336_s8 }
  0x4c   :  { %p213_p6 = scmp.lt.s32.totalorder %s211_s20, %s207_s19 }
  0x4e   :  { %p214_p7 = por %p213_p6, %p212_p5 }
  0x50   :  { %p215_p8 = pnand %p214_p7, %p208_p4 }
  0x52   :  { %218 = shalt.err (!%p215_p8)
}
  0x53   :  { %s219_s24 = scalar_lea.hbm %s393_s3, 16 }
  0x54   :  { %p220_p9 = scmp.ne.s32.totalorder %s393_s3, %s219_s24  ;;  %p223_p10 = scmp.lt.u32.totalorder %s219_s24, %s393_s3 }
  0x56   :  { %p225_p11 = pnand %p223_p10, %p220_p9 }
  0x58   :  { %228 = shalt.err (!%p225_p11)
}
  0x59   :  { %75 = dma.vmem_to_hbm [thread:$0]  %s336_s8, 16, %s393_s3, [#allocation4]  }
  0x5a   :  { %s229_s30 = scalar_lea.vmem %s338_s10, 256  ;;  %p234_p13 = scmp.lt.s32.totalorder %s338_s10, %s338_s10 }
  0x5b   :  { %p230_p12 = scmp.ne.s32.totalorder %s338_s10, %s229_s30  ;;  %p235_p0 = scmp.lt.s32.totalorder %s229_s30, %s229_s30 }
  0x5d   :  { %p236_p1 = por %p235_p0, %p234_p13 }
  0x5f   :  { %p237_p2 = pnand %p236_p1, %p230_p12 }
  0x61   :  { %240 = shalt.err (!%p237_p2)
}
  0x62   :  { %s241_s9 = scalar_lea.hbm %s395_s5, 256 }
  0x63   :  { %p242_p3 = scmp.ne.s32.totalorder %s395_s5, %s241_s9  ;;  %p245_p4 = scmp.lt.u32.totalorder %s241_s9, %s395_s5 }
  0x65   :  { %p247_p5 = pnand %p245_p4, %p242_p3 }
  0x67   :  { %250 = shalt.err (!%p247_p5)
}
  0x68   :  { %97 = dma.vmem_to_hbm [thread:$0]  %s338_s10, 256, %s395_s5, [#allocation10], %s262_s0, %s262_s0, %s263_s21  }
  0x69   :  { %255 = dma.done.wait [#allocation4], 16  }
  0x6a   :  { %256 = vsyncadd [#allocation4], 4294967280 }
  0x6b   :  { %257 = dma.done.wait [#allocation10], 384  }
  0x6c   :  { %258 = vsyncadd [#allocation10], 4294966912 }
  0x6d   :  { %107 = vsyncpa [#allocation3], 1 }
  0x6e   :  { %108 = vsyncpa [#allocation6], 1 }
  0x6f   :  { %109 = vsyncpa [#allocation4], 1 }
  0x70   :  { %110 = vsyncpa [#allocation10], 1 }

</bundles_post_ra>
